<compile_context>
chip_gen: v7x
topology: tpu7x:2x2x1
jax: 0.10.0
libtpu: 0.0.40
codegen_flags: <defaults>
</compile_context>

<pallas_src>
import jax
import jax.numpy as jnp
from jax.experimental import pallas as pl
from jax.experimental.pallas import tpu as pltpu

PAD = 128          # lane-padded feature width for every hidden layer
NUM_CLASSES = 10   # real output width (written directly, no padded-output slice pass)


# ---------------------------------------------------------------------------------
# Fused kernel: grid = (phase, batch_tile)
#   phase 0: logits per batch tile -> VMEM scratch; online column (axis-0) max/sum(exp)
#   phase 1: out = h2 - lse  (narrow (tb, 10) store)
# ---------------------------------------------------------------------------------
def secondnet_kernel(x_ref, w0_ref, b0_ref, w1_ref, b1_ref, w2_ref, b2_ref,
                     o_ref, h2_sc, m_sc, l_sc):
    phase = pl.program_id(0)
    i = pl.program_id(1)

    @pl.when(phase == 0)
    def _phase0():
        @pl.when(i == 0)
        def _init():
            m_sc[...] = jnp.full_like(m_sc, -jnp.inf)
            l_sc[...] = jnp.zeros_like(l_sc)

        # x streamed as f32; cast to bf16 in-kernel (MXU operand).
        x = x_ref[...].astype(jnp.bfloat16)                       # (tb, D)

        # fc0 + relu (dropout1 -> identity); bf16 MXU operands, f32 accumulate.
        h0 = jnp.dot(x, w0_ref[...], preferred_element_type=jnp.float32) + b0_ref[...]
        h0 = jnp.maximum(h0, 0.0)

        # fc1 + relu (dropout2 -> identity)
        h1 = jnp.dot(h0.astype(jnp.bfloat16), w1_ref[...],
                     preferred_element_type=jnp.float32) + b1_ref[...]
        h1 = jnp.maximum(h1, 0.0)

        # fc2 + relu
        h2 = jnp.dot(h1.astype(jnp.bfloat16), w2_ref[...],
                     preferred_element_type=jnp.float32) + b2_ref[...]
        h2 = jnp.maximum(h2, 0.0)                                 # (tb, PAD) f32

        h2_sc[i] = h2        # stays in VMEM; never round-trips HBM

        # Online accumulation of column-wise (axis 0) max and sum(exp) across tiles.
        # Safe with the -inf init because ReLU guarantees h2 >= 0 per column.
        m_new = jnp.maximum(m_sc[...], jnp.max(h2, axis=0, keepdims=True))
        l_sc[...] = (l_sc[...] * jnp.exp(m_sc[...] - m_new)
                     + jnp.sum(jnp.exp(h2 - m_new), axis=0, keepdims=True))
        m_sc[...] = m_new

        @pl.when(i == pl.num_programs(1) - 1)
        def _finish_lse():
            # Reuse m_sc as lse = m + log(l) for phase 1.
            m_sc[...] = m_sc[...] + jnp.log(l_sc[...])

    @pl.when(phase == 1)
    def _phase1():
        out = h2_sc[i] - m_sc[...]                 # (tb, PAD) f32
        o_ref[...] = out[:, :NUM_CLASSES]          # direct (tb, 10) store


def _pick_block_b(batch):
    # Bigger tiles amortize the ~0.35 us per-grid-step overhead; min 16 keeps bf16
    # (16, 128) packed vregs full.
    for tb in (2048, 1024, 512, 256, 128, 64, 32, 16):
        if batch % tb == 0:
            return tb
    return batch  # fallback: single full-batch tile (block == full dim is legal)


def secondnet_forward(x_nchw, params, block_b=None):
    """x_nchw: (B, C, H, W) float32; params: lane-padded weights (bf16) / biases (f32)."""
    B = x_nchw.shape[0]
    x2d = x_nchw.reshape(B, -1)              # x.view(-1, image_size); stays f32
    D = x2d.shape[1]

    tb = block_b if block_b is not None else _pick_block_b(B)
    assert B % tb == 0, "batch must be divisible by the batch tile"
    n_tiles = B // tb

    # VMEM-resident h2 scratch; fine up to ~100K rows even on v7x's 64 MiB.
    h2_scratch_bytes = n_tiles * tb * PAD * 4
    assert h2_scratch_bytes <= 48 * 1024 * 1024, "h2 scratch too big for VMEM"
    # TODO(synk): for B beyond ~100K rows, spill h2 to an HBM scratch (bf16) instead.

    w0t, b0 = params["w0t"], params["b0"]    # (D, 128) bf16, (1, 128) f32
    w1t, b1 = params["w1t"], params["b1"]    # (128, 128) bf16, (1, 128) f32
    w2t, b2 = params["w2t"], params["b2"]    # (128, 128) bf16, (1, 128) f32

    weight_bytes = (D * PAD + 2 * PAD * PAD) * 2 + 3 * PAD * 4
    vmem_est = (2 * tb * D * 4               # x tile (f32, double-buffered)
                + 2 * weight_bytes           # resident weights/biases (double-buffered)
                + 2 * tb * PAD * 4           # out tile (padded-lane over-estimate)
                + h2_scratch_bytes           # h2 scratch
                + 2 * PAD * 4)               # m / l scratch
    vmem_limit = int(min(max(2 * vmem_est, 32 * 1024 * 1024), 100 * 1024 * 1024))

    cost = pl.CostEstimate(
        flops=2 * B * PAD * (D + 2 * PAD),
        transcendentals=B * PAD + PAD,
        bytes_accessed=B * D * 4 + B * NUM_CLASSES * 4 + weight_bytes,
    )

    out = pl.pallas_call(
        secondnet_kernel,
        out_shape=jax.ShapeDtypeStruct((B, NUM_CLASSES), jnp.float32),
        grid_spec=pltpu.PrefetchScalarGridSpec(
            num_scalar_prefetch=0,
            grid=(2, n_tiles),               # (phase, batch tile); phase-major
            in_specs=[
                # x: streams per tile in phase 0; pinned to block 0 in phase 1
                pl.BlockSpec((tb, D), lambda p, i: ((1 - p) * i, 0)),
                # weights / biases: DMA'd once, stay resident
                pl.BlockSpec((D, PAD), lambda p, i: (0, 0)),
                pl.BlockSpec((1, PAD), lambda p, i: (0, 0)),
                pl.BlockSpec((PAD, PAD), lambda p, i: (0, 0)),
                pl.BlockSpec((1, PAD), lambda p, i: (0, 0)),
                pl.BlockSpec((PAD, PAD), lambda p, i: (0, 0)),
                pl.BlockSpec((1, PAD), lambda p, i: (0, 0)),
            ],
            # phase 0 -> block (0,0) (never flushed before phase 1 overwrites it);
            # phase 1 -> block (i,0), written with the real log-probs.
            out_specs=pl.BlockSpec((tb, NUM_CLASSES), lambda p, i: (p * i, 0)),
            scratch_shapes=[
                pltpu.VMEM((n_tiles, tb, PAD), jnp.float32),   # h2 (all tiles)
                pltpu.VMEM((1, PAD), jnp.float32),             # running max -> lse
                pltpu.VMEM((1, PAD), jnp.float32),             # running sum(exp)
            ],
        ),
        compiler_params=pltpu.CompilerParams(
            dimension_semantics=("arbitrary", "arbitrary"),
            vmem_limit_bytes=vmem_limit),
        cost_estimate=cost,
    )(x2d, w0t, b0, w1t, b1, w2t, b2)

    return out


def init_params(key, image_size):
    """PyTorch-Linear-style init, stored transposed (in, out) and zero-padded to
    128 lanes at init time.  Weights are bf16 (MXU operands), biases f32."""
    k0, k1, k2, k3, k4, k5 = jax.random.split(key, 6)

    def lin(kw, kb, fan_in, fan_out):
        bound = 1.0 / jnp.sqrt(jnp.float32(fan_in))
        w = jax.random.uniform(kw, (fan_in, fan_out), jnp.float32, -bound, bound)
        b = jax.random.uniform(kb, (1, fan_out), jnp.float32, -bound, bound)
        return w, b

    w0, b0 = lin(k0, k1, image_size, 100)
    w1, b1 = lin(k2, k3, 100, 50)
    w2, b2 = lin(k4, k5, 50, 10)

    w0p = jnp.zeros((image_size, PAD), jnp.float32).at[:, :100].set(w0)
    w1p = jnp.zeros((PAD, PAD), jnp.float32).at[:100, :50].set(w1)
    w2p = jnp.zeros((PAD, PAD), jnp.float32).at[:50, :10].set(w2)
    b0p = jnp.zeros((1, PAD), jnp.float32).at[:, :100].set(b0)
    b1p = jnp.zeros((1, PAD), jnp.float32).at[:, :50].set(b1)
    b2p = jnp.zeros((1, PAD), jnp.float32).at[:, :10].set(b2)

    return {"w0t": w0p.astype(jnp.bfloat16), "b0": b0p,
            "w1t": w1p.astype(jnp.bfloat16), "b1": b1p,
            "w2t": w2p.astype(jnp.bfloat16), "b2": b2p}


def reference_forward(x_nchw, params):
    """Pure-JAX reference with identical numerics (bf16 operands, f32 accumulate)."""
    B = x_nchw.shape[0]
    x = x_nchw.reshape(B, -1).astype(jnp.bfloat16)
    h = jnp.maximum(jnp.dot(x, params["w0t"],
                            preferred_element_type=jnp.float32) + params["b0"], 0.0)
    h = jnp.maximum(jnp.dot(h.astype(jnp.bfloat16), params["w1t"],
                            preferred_element_type=jnp.float32) + params["b1"], 0.0)
    h = jnp.maximum(jnp.dot(h.astype(jnp.bfloat16), params["w2t"],
                            preferred_element_type=jnp.float32) + params["b2"], 0.0)
    return jax.nn.log_softmax(h, axis=0)[:, :NUM_CLASSES]


if __name__ == "__main__":
    key = jax.random.PRNGKey(0)
    k_x, k_p = jax.random.split(key)

    # Small MNIST-like example: batch=64, 1 channel, 16x16 image -> image_size=256.
    B, C, H, W = 64, 1, 16, 16
    image_size = C * H * W
    x = jax.random.normal(k_x, (B, C, H, W), jnp.float32)
    params = init_params(k_p, image_size)
    ref = reference_forward(x, params)

    # block_b=16 -> 4 batch tiles: exercises the cross-tile online-lse accumulator
    # and the phase-0 / phase-1 scratch handoff.
    out = jax.block_until_ready(secondnet_forward(x, params, block_b=16))
    assert out.shape == (B, NUM_CLASSES)
    assert jnp.allclose(out, ref, atol=2e-3, rtol=2e-3), float(jnp.max(jnp.abs(out - ref)))

    # Default tiling path (single 64-row tile).
    out2 = jax.block_until_ready(secondnet_forward(x, params))
    assert jnp.allclose(out2, ref, atol=2e-3, rtol=2e-3), float(jnp.max(jnp.abs(out2 - ref)))

    print("KERNEL_OK")
</pallas_src>

<mosaic_0001>
module attributes {stable_mosaic.version = 11 : i64} {
  func.func @secondnet_kernel(%arg0: i32, %arg1: i32, %arg2: memref<16x256xf32, #tpu.memory_space<vmem>>, %arg3: memref<256x128xbf16, #tpu.memory_space<vmem>>, %arg4: memref<1x128xf32, #tpu.memory_space<vmem>>, %arg5: memref<128x128xbf16, #tpu.memory_space<vmem>>, %arg6: memref<1x128xf32, #tpu.memory_space<vmem>>, %arg7: memref<128x128xbf16, #tpu.memory_space<vmem>>, %arg8: memref<1x128xf32, #tpu.memory_space<vmem>>, %arg9: memref<16x10xf32, #tpu.memory_space<vmem>>, %arg10: memref<4x16x128xf32, #tpu.memory_space<vmem>>, %arg11: memref<1x128xf32, #tpu.memory_space<vmem>>, %arg12: memref<1x128xf32, #tpu.memory_space<vmem>>) attributes {dimension_semantics = [#tpu.dimension_semantics<arbitrary>, #tpu.dimension_semantics<arbitrary>], iteration_bounds = array<i64: 2, 4>, scalar_prefetch = 0 : i64, scratch_operands = 3 : i64, tpu.core_type = #tpu.core_type<tc>, window_params = [{transform_indices = @transform_0, window_bounds = array<i64: 16, 256>}, {pipeline_mode = #tpu.pipeline_mode<synchronous>, transform_indices = @transform_1, window_bounds = array<i64: 256, 128>}, {pipeline_mode = #tpu.pipeline_mode<synchronous>, transform_indices = @transform_2, window_bounds = array<i64: 1, 128>}, {pipeline_mode = #tpu.pipeline_mode<synchronous>, transform_indices = @transform_3, window_bounds = array<i64: 128, 128>}, {pipeline_mode = #tpu.pipeline_mode<synchronous>, transform_indices = @transform_4, window_bounds = array<i64: 1, 128>}, {pipeline_mode = #tpu.pipeline_mode<synchronous>, transform_indices = @transform_5, window_bounds = array<i64: 128, 128>}, {pipeline_mode = #tpu.pipeline_mode<synchronous>, transform_indices = @transform_6, window_bounds = array<i64: 1, 128>}, {transform_indices = @transform_7, window_bounds = array<i64: 16, 10>}]} {
    %c0_i32 = arith.constant 0 : i32
    %0 = arith.cmpi eq, %arg0, %c0_i32 : i32
    %1 = arith.extui %0 : i1 to i32
    %c0_i32_0 = arith.constant 0 : i32
    %2 = arith.cmpi ne, %1, %c0_i32_0 : i32
    scf.if %2 {
      %c0_i32_2 = arith.constant 0 : i32
      %6 = arith.cmpi eq, %arg1, %c0_i32_2 : i32
      %7 = arith.extui %6 : i1 to i32
      %c0_i32_3 = arith.constant 0 : i32
      %8 = arith.cmpi ne, %7, %c0_i32_3 : i32
      scf.if %8 {
        %cst_37 = arith.constant 0xFF800000 : f32
        %58 = vector.broadcast %cst_37 : f32 to vector<1x128xf32>
        %c0_38 = arith.constant 0 : index
        %c0_39 = arith.constant 0 : index
        %59 = vector.load %arg11[%c0_38, %c0_39] : memref<1x128xf32, #tpu.memory_space<vmem>>, vector<1x128xf32>
        tpu.vector_store %arg11[%c0_38, %c0_39], %58 {strides = array<i32>} : memref<1x128xf32, #tpu.memory_space<vmem>>, vector<1x128xf32>,
        %cst_40 = arith.constant 0.000000e+00 : f32
        %60 = vector.broadcast %cst_40 : f32 to vector<1x128xf32>
        %c0_41 = arith.constant 0 : index
        %c0_42 = arith.constant 0 : index
        %61 = vector.load %arg12[%c0_41, %c0_42] : memref<1x128xf32, #tpu.memory_space<vmem>>, vector<1x128xf32>
        tpu.vector_store %arg12[%c0_41, %c0_42], %60 {strides = array<i32>} : memref<1x128xf32, #tpu.memory_space<vmem>>, vector<1x128xf32>,
      } else {
      }
      %c0 = arith.constant 0 : index
      %c0_4 = arith.constant 0 : index
      %9 = vector.load %arg2[%c0, %c0_4] : memref<16x256xf32, #tpu.memory_space<vmem>>, vector<16x256xf32>
      %10 = arith.truncf %9 : vector<16x256xf32> to vector<16x256xbf16>
      %c0_5 = arith.constant 0 : index
      %c0_6 = arith.constant 0 : index
      %11 = vector.load %arg3[%c0_5, %c0_6] : memref<256x128xbf16, #tpu.memory_space<vmem>>, vector<256x128xbf16>
      %cst = arith.constant dense<0.000000e+00> : vector<16x128xf32>
      %12 = tpu.matmul %10, %11, %cst {dimension_numbers = #tpu.dot_dimension_numbers<[1], [0], [0], [1], [0, 0, 1, 1], [], []>} : vector<16x256xbf16>, vector<256x128xbf16>, vector<16x128xf32> -> vector<16x128xf32>
      %c0_7 = arith.constant 0 : index
      %c0_8 = arith.constant 0 : index
      %13 = vector.load %arg4[%c0_7, %c0_8] : memref<1x128xf32, #tpu.memory_space<vmem>>, vector<1x128xf32>
      %14 = vector.broadcast %13 : vector<1x128xf32> to vector<16x128xf32>
      %15 = arith.addf %12, %14 : vector<16x128xf32>
      %cst_9 = arith.constant 0.000000e+00 : f32
      %16 = vector.broadcast %cst_9 : f32 to vector<16x128xf32>
      %17 = arith.maximumf %15, %16 : vector<16x128xf32>
      %18 = arith.truncf %17 : vector<16x128xf32> to vector<16x128xbf16>
      %c0_10 = arith.constant 0 : index
      %c0_11 = arith.constant 0 : index
      %19 = vector.load %arg5[%c0_10, %c0_11] : memref<128x128xbf16, #tpu.memory_space<vmem>>, vector<128x128xbf16>
      %cst_12 = arith.constant dense<0.000000e+00> : vector<16x128xf32>
      %20 = tpu.matmul %18, %19, %cst_12 {dimension_numbers = #tpu.dot_dimension_numbers<[1], [0], [0], [1], [0, 0, 1, 1], [], []>} : vector<16x128xbf16>, vector<128x128xbf16>, vector<16x128xf32> -> vector<16x128xf32>
      %c0_13 = arith.constant 0 : index
      %c0_14 = arith.constant 0 : index
      %21 = vector.load %arg6[%c0_13, %c0_14] : memref<1x128xf32, #tpu.memory_space<vmem>>, vector<1x128xf32>
      %22 = vector.broadcast %21 : vector<1x128xf32> to vector<16x128xf32>
      %23 = arith.addf %20, %22 : vector<16x128xf32>
      %cst_15 = arith.constant 0.000000e+00 : f32
      %24 = vector.broadcast %cst_15 : f32 to vector<16x128xf32>
      %25 = arith.maximumf %23, %24 : vector<16x128xf32>
      %26 = arith.truncf %25 : vector<16x128xf32> to vector<16x128xbf16>
      %c0_16 = arith.constant 0 : index
      %c0_17 = arith.constant 0 : index
      %27 = vector.load %arg7[%c0_16, %c0_17] : memref<128x128xbf16, #tpu.memory_space<vmem>>, vector<128x128xbf16>
      %cst_18 = arith.constant dense<0.000000e+00> : vector<16x128xf32>
      %28 = tpu.matmul %26, %27, %cst_18 {dimension_numbers = #tpu.dot_dimension_numbers<[1], [0], [0], [1], [0, 0, 1, 1], [], []>} : vector<16x128xbf16>, vector<128x128xbf16>, vector<16x128xf32> -> vector<16x128xf32>
      %c0_19 = arith.constant 0 : index
      %c0_20 = arith.constant 0 : index
      %29 = vector.load %arg8[%c0_19, %c0_20] : memref<1x128xf32, #tpu.memory_space<vmem>>, vector<1x128xf32>
      %30 = vector.broadcast %29 : vector<1x128xf32> to vector<16x128xf32>
      %31 = arith.addf %28, %30 : vector<16x128xf32>
      %cst_21 = arith.constant 0.000000e+00 : f32
      %32 = vector.broadcast %cst_21 : f32 to vector<16x128xf32>
      %33 = arith.maximumf %31, %32 : vector<16x128xf32>
      %34 = arith.index_cast %arg1 : i32 to index
      %c0_22 = arith.constant 0 : index
      %c0_23 = arith.constant 0 : index
      %35 = vector.load %arg10[%34, %c0_22, %c0_23] : memref<4x16x128xf32, #tpu.memory_space<vmem>>, vector<1x16x128xf32>
      %36 = vector.shape_cast %35 : vector<1x16x128xf32> to vector<16x128xf32>
      %37 = vector.shape_cast %33 : vector<16x128xf32> to vector<1x16x128xf32>
      tpu.vector_store %arg10[%34, %c0_22, %c0_23], %37 {strides = array<i32>} : memref<4x16x128xf32, #tpu.memory_space<vmem>>, vector<1x16x128xf32>,
      %c0_24 = arith.constant 0 : index
      %c0_25 = arith.constant 0 : index
      %38 = vector.load %arg11[%c0_24, %c0_25] : memref<1x128xf32, #tpu.memory_space<vmem>>, vector<1x128xf32>
      %cst_26 = arith.constant dense<0xFF800000> : vector<128xf32>
      %39 = vector.multi_reduction <maximumf>, %33, %cst_26 [0] : vector<16x128xf32> to vector<128xf32>
      %40 = vector.shape_cast %39 : vector<128xf32> to vector<1x128xf32>
      %41 = arith.maximumf %38, %40 : vector<1x128xf32>
      %c0_27 = arith.constant 0 : index
      %c0_28 = arith.constant 0 : index
      %42 = vector.load %arg12[%c0_27, %c0_28] : memref<1x128xf32, #tpu.memory_space<vmem>>, vector<1x128xf32>
      %c0_29 = arith.constant 0 : index
      %c0_30 = arith.constant 0 : index
      %43 = vector.load %arg11[%c0_29, %c0_30] : memref<1x128xf32, #tpu.memory_space<vmem>>, vector<1x128xf32>
      %44 = arith.subf %43, %41 : vector<1x128xf32>
      %45 = math.exp %44 : vector<1x128xf32>
      %46 = arith.mulf %42, %45 : vector<1x128xf32>
      %47 = vector.broadcast %41 : vector<1x128xf32> to vector<16x128xf32>
      %48 = arith.subf %33, %47 : vector<16x128xf32>
      %49 = math.exp %48 : vector<16x128xf32>
      %cst_31 = arith.constant dense<0.000000e+00> : vector<128xf32>
      %50 = vector.multi_reduction <add>, %49, %cst_31 [0] : vector<16x128xf32> to vector<128xf32>
      %51 = vector.shape_cast %50 : vector<128xf32> to vector<1x128xf32>
      %52 = arith.addf %46, %51 : vector<1x128xf32>
      %c0_32 = arith.constant 0 : index
      %c0_33 = arith.constant 0 : index
      %53 = vector.load %arg12[%c0_32, %c0_33] : memref<1x128xf32, #tpu.memory_space<vmem>>, vector<1x128xf32>
      tpu.vector_store %arg12[%c0_32, %c0_33], %52 {strides = array<i32>} : memref<1x128xf32, #tpu.memory_space<vmem>>, vector<1x128xf32>,
      %c0_34 = arith.constant 0 : index
      %c0_35 = arith.constant 0 : index
      %54 = vector.load %arg11[%c0_34, %c0_35] : memref<1x128xf32, #tpu.memory_space<vmem>>, vector<1x128xf32>
      tpu.vector_store %arg11[%c0_34, %c0_35], %41 {strides = array<i32>} : memref<1x128xf32, #tpu.memory_space<vmem>>, vector<1x128xf32>,
      %c3_i32 = arith.constant 3 : i32
      %55 = arith.cmpi eq, %arg1, %c3_i32 : i32
      %56 = arith.extui %55 : i1 to i32
      %c0_i32_36 = arith.constant 0 : i32
      %57 = arith.cmpi ne, %56, %c0_i32_36 : i32
      scf.if %57 {
        %c0_37 = arith.constant 0 : index
        %c0_38 = arith.constant 0 : index
        %58 = vector.load %arg11[%c0_37, %c0_38] : memref<1x128xf32, #tpu.memory_space<vmem>>, vector<1x128xf32>
        %c0_39 = arith.constant 0 : index
        %c0_40 = arith.constant 0 : index
        %59 = vector.load %arg12[%c0_39, %c0_40] : memref<1x128xf32, #tpu.memory_space<vmem>>, vector<1x128xf32>
        %60 = math.log %59 : vector<1x128xf32>
        %61 = arith.addf %58, %60 : vector<1x128xf32>
        %c0_41 = arith.constant 0 : index
        %c0_42 = arith.constant 0 : index
        %62 = vector.load %arg11[%c0_41, %c0_42] : memref<1x128xf32, #tpu.memory_space<vmem>>, vector<1x128xf32>
        tpu.vector_store %arg11[%c0_41, %c0_42], %61 {strides = array<i32>} : memref<1x128xf32, #tpu.memory_space<vmem>>, vector<1x128xf32>,
      } else {
      }
    } else {
    }
    %c1_i32 = arith.constant 1 : i32
    %3 = arith.cmpi eq, %arg0, %c1_i32 : i32
    %4 = arith.extui %3 : i1 to i32
    %c0_i32_1 = arith.constant 0 : i32
    %5 = arith.cmpi ne, %4, %c0_i32_1 : i32
    scf.if %5 {
      %6 = arith.index_cast %arg1 : i32 to index
      %c0 = arith.constant 0 : index
      %c0_2 = arith.constant 0 : index
      %7 = vector.load %arg10[%6, %c0, %c0_2] : memref<4x16x128xf32, #tpu.memory_space<vmem>>, vector<1x16x128xf32>
      %8 = vector.shape_cast %7 : vector<1x16x128xf32> to vector<16x128xf32>
      %c0_3 = arith.constant 0 : index
      %c0_4 = arith.constant 0 : index
      %9 = vector.load %arg11[%c0_3, %c0_4] : memref<1x128xf32, #tpu.memory_space<vmem>>, vector<1x128xf32>
      %10 = vector.broadcast %9 : vector<1x128xf32> to vector<16x128xf32>
      %11 = arith.subf %8, %10 : vector<16x128xf32>
      %12 = vector.extract_strided_slice %11 {offsets = [0, 0], sizes = [16, 10], strides = [1, 1]} : vector<16x128xf32> to vector<16x10xf32>
      %c0_5 = arith.constant 0 : index
      %c0_6 = arith.constant 0 : index
      %13 = vector.load %arg9[%c0_5, %c0_6] : memref<16x10xf32, #tpu.memory_space<vmem>>, vector<16x10xf32>
      tpu.vector_store %arg9[%c0_5, %c0_6], %12 {strides = array<i32>} : memref<16x10xf32, #tpu.memory_space<vmem>>, vector<16x10xf32>,
    } else {
    }
    return
  }
  func.func @transform_0(%arg0: i32, %arg1: i32) -> (i32, i32) {
    %c1_i32 = arith.constant 1 : i32
    %0 = arith.subi %c1_i32, %arg0 : i32
    %1 = arith.muli %0, %arg1 : i32
    %c0_i32 = arith.constant 0 : i32
    %c0_i32_0 = arith.constant 0 : i32
    return %1, %c0_i32 : i32, i32
  }
  func.func @transform_1(%arg0: i32, %arg1: i32) -> (i32, i32) {
    %c0_i32 = arith.constant 0 : i32
    %c0_i32_0 = arith.constant 0 : i32
    %c0_i32_1 = arith.constant 0 : i32
    return %c0_i32, %c0_i32_0 : i32, i32
  }
  func.func @transform_2(%arg0: i32, %arg1: i32) -> (i32, i32) {
    %c0_i32 = arith.constant 0 : i32
    %c0_i32_0 = arith.constant 0 : i32
    %c0_i32_1 = arith.constant 0 : i32
    return %c0_i32, %c0_i32_0 : i32, i32
  }
  func.func @transform_3(%arg0: i32, %arg1: i32) -> (i32, i32) {
    %c0_i32 = arith.constant 0 : i32
    %c0_i32_0 = arith.constant 0 : i32
    %c0_i32_1 = arith.constant 0 : i32
    return %c0_i32, %c0_i32_0 : i32, i32
  }
  func.func @transform_4(%arg0: i32, %arg1: i32) -> (i32, i32) {
    %c0_i32 = arith.constant 0 : i32
    %c0_i32_0 = arith.constant 0 : i32
    %c0_i32_1 = arith.constant 0 : i32
    return %c0_i32, %c0_i32_0 : i32, i32
  }
  func.func @transform_5(%arg0: i32, %arg1: i32) -> (i32, i32) {
    %c0_i32 = arith.constant 0 : i32
    %c0_i32_0 = arith.constant 0 : i32
    %c0_i32_1 = arith.constant 0 : i32
    return %c0_i32, %c0_i32_0 : i32, i32
  }
  func.func @transform_6(%arg0: i32, %arg1: i32) -> (i32, i32) {
    %c0_i32 = arith.constant 0 : i32
    %c0_i32_0 = arith.constant 0 : i32
    %c0_i32_1 = arith.constant 0 : i32
    return %c0_i32, %c0_i32_0 : i32, i32
  }
  func.func @transform_7(%arg0: i32, %arg1: i32) -> (i32, i32) {
    %0 = arith.muli %arg0, %arg1 : i32
    %c0_i32 = arith.constant 0 : i32
    %c0_i32_0 = arith.constant 0 : i32
    return %0, %c0_i32 : i32, i32
  }
}

</mosaic_0001>

<bundles_post_ra>
// kernel: tpu_custom_call.1
= control target key start
LH: loop header
LB: loop body
LE: loop exit
PB: predicated region body
PF: predicated region fallthrough
CT: control target
= control target key end

     0   :  { %s1815_s0 = inlined_call_operand.hbm [shape: f32[64,256], index: 0, kind: input, shape index: {}]   ;;  %s1816_s1 = inlined_call_operand.hbm [shape: bf16[256,128], index: 1, kind: input, shape index: {}]   ;;  %s1817_s2 = inlined_call_operand.vmem [shape: f32[1,128], index: 2, kind: input, shape index: {}]   ;;  %s1818_s3 = inlined_call_operand.hbm [shape: bf16[128,128], index: 3, kind: input, shape index: {}]   ;;  %s1819_s4 = inlined_call_operand.vmem [shape: f32[1,128], index: 4, kind: input, shape index: {}]   ;;  %s1820_s5 = inlined_call_operand.hbm [shape: bf16[128,128], index: 5, kind: input, shape index: {}]   ;;  %s1821_s6 = inlined_call_operand.vmem [shape: f32[1,128], index: 6, kind: input, shape index: {}]   ;;  %s1822_s7 = inlined_call_operand.vmem [shape: f32[64,10], index: 7, kind: output, shape index: {}]  }
   0x1   :  { %1827 = sst [smem:[#allocation15_spill]] %s1817_s2 }
   0x2   :  { %1828 = sst [smem:[#allocation16_spill]] %s1819_s4 }
   0x3   :  { %1829 = sst [smem:[#allocation17_spill]] %s1821_s6 }
   0x4   :  { %12 = vsyncpa [#allocation6], 0 }
   0x5   :  { %14 = vsyncpa [#allocation6 + $0x1], 0 }
   0x6   :  { %15 = vsyncpa [#allocation8], 0 }
   0x7   :  { %16 = vsyncpa [#allocation11], 0  ;;  %s1517_s24 = smov 0   ;;  %s1519_s25 = smov 0  }
   0x8   :  { %s1521_s26 = smov 0   ;;  %s1523_s27 = smov 0  }
   0x9   :  { %s1525_s28 = smov 0   ;;  %s1527_s29 = smov 0  }
   0xa   :  { %s1529_s30 = smov 0   ;;  %s1531_s8 = smov 0  }
   0xb LB: > { %s981_s9 = sadd.s32 4294967295, %s1463_s8   ;;  %p58_p0 = scmp.ne.s32.totalorder %s1439_s25, %s1435_s24  ;;  %s1463_s8 = sphi %s1531_s8, %s22_s8   ;;  %s1459_s30 = sphi %s1529_s30, %s1848_s30   ;;  %s1455_s29 = sphi %s1527_s29, %s1847_s29   ;;  %s1451_s28 = sphi %s1525_s28, %s1846_s28   ;;  %s1447_s27 = sphi %s1523_s27, %s1845_s27   ;;  %s1443_s26 = sphi %s1521_s26, %s1844_s26   ;;  %s1439_s25 = sphi %s1519_s25, %s1843_s25   ;;  %s1435_s24 = sphi %s1517_s24, %s1842_s24  }
   0xc   : > { %p1557_p1 = scmp.eq.s32.totalorder %s981_s9, 0  ;;  %p983_p2 = scmp.ge.s32.totalorder %s1463_s8, 1 }
   0xd   : > { %p223_p3 = scmp.lt.s32.totalorder %s1463_s8, 9  ;;  %s1465_s13 = smov [#allocation7]  }
   0xe   : > { %s1830_s10 = scalar_select %p1557_p1, 1, 0 }
   0xf   : > { %p1565_p4 = por %p1557_p1, %p58_p0  ;;  %p1569_p5 = pnand %p983_p2, %p223_p3 }
  0x10   : > { %s235_s14 = sshll.u32 %s1465_s13, 4  ;;  %s1466_s16 = smov [#allocation9]   ;;  %s1573_s14 = int_to_ptr.vmem [resolvable:$true] %s235_s14 }
  0x11   : > { %s1831_s11 = scalar_select %p1565_p4, 1, 0 }
  0x12   : > { %s1832_s12 = scalar_select %p1569_p5, 1, 0 }
  0x13   : > { %p1139_p6 = pneg %p1569_p5  ;;  %s251_s17 = sshll.u32 %s1466_s16, 4  ;;  %s1583_s17 = int_to_ptr.vmem [resolvable:$true] %s251_s17 }
  0x14   : > { %s1467_s18 = smov [#allocation10]   ;;  %s1275_s22 = scalar_lea.hbm %s1816_s1, 2048 }
  0x15   : > { %p1579_p7 = pnand %p1139_p6, %p1557_p1  ;;  %s1585_s19 = sshll.u32 %s1467_s18, 4  ;;  %s268_s19 = int_to_ptr.vmem [resolvable:$true] %s1585_s19 }
  0x16   : > { %p1276_p8 = scmp.ne.s32.totalorder %s1816_s1, %s1275_s22  ;;  %p1282_p12 = scmp.lt.u32.totalorder %s1275_s22, %s1816_s1 }
  0x17   : > { %p1595_p9 = pneg %p1579_p7 }
  0x19   : > { %p1278_p10 = pnand %p1595_p9, %p1276_p8 }
  0x1b   : > { %p1279_p11 = pneg %p1278_p10 }
  0x1d   : > { %p1284_p13 = pnand %p1282_p12, %p1279_p11 }
  0x1f   : > { %1287 = shalt.err (!%p1284_p13)
}
  0x20   : > { %s1288_s18 = scalar_lea.vmem %s1573_s14, 2048  ;;  %p1296_p6 = scmp.lt.s32.totalorder %s1573_s14, %s1573_s14 }
  0x21   : > { %p1289_p0 = scmp.ne.s32.totalorder %s1573_s14, %s1288_s18  ;;  %p1297_p1 = scmp.lt.s32.totalorder %s1288_s18, %s1288_s18 }
  0x23   : > { %p1291_p2 = pnand %p1289_p0, %p1595_p9  ;;  %p1298_p8 = por %p1297_p1, %p1296_p6 }
  0x25   : > { %p1292_p3 = pneg %p1291_p2 }
  0x27   : > { %p1299_p10 = pnand %p1298_p8, %p1292_p3 }
  0x29   : > { %1302 = shalt.err (!%p1299_p10)
}
  0x2a   : > { %s1468_s20 = smov 64   ;;  %s1469_s21 = smov 4  }
  0x2b   : > { %1142 = dma.hbm_to_vmem [thread:$0]  (!%p1579_p7), %s1816_s1, 2048, %s1573_s14, [#allocation8], %s1468_s20, %s1468_s20, %s1469_s21  }
  0x2c   : > { %s1303_s16 = scalar_lea.hbm %s1818_s3, 1024 }
  0x2d   : > { %p1304_p1 = scmp.ne.s32.totalorder %s1818_s3, %s1303_s16  ;;  %p1310_p13 = scmp.lt.u32.totalorder %s1303_s16, %s1818_s3 }
  0x2f   : > { %p1306_p11 = pnand %p1304_p1, %p1595_p9 }
  0x31   : > { %p1307_p12 = pneg %p1306_p11 }
  0x33   : > { %p1312_p0 = pnand %p1310_p13, %p1307_p12 }
  0x35   : > { %1315 = shalt.err (!%p1312_p0)
}
  0x36   : > { %s1316_s14 = scalar_lea.vmem %s1583_s17, 1024  ;;  %p1324_p8 = scmp.lt.s32.totalorder %s1583_s17, %s1583_s17 }
  0x37   : > { %p1317_p2 = scmp.ne.s32.totalorder %s1583_s17, %s1316_s14  ;;  %p1325_p10 = scmp.lt.s32.totalorder %s1316_s14, %s1316_s14 }
  0x39   : > { %p1319_p3 = pnand %p1317_p2, %p1595_p9  ;;  %p1326_p1 = por %p1325_p10, %p1324_p8 }
  0x3b   : > { %p1320_p6 = pneg %p1319_p3 }
  0x3d   : > { %p1327_p11 = pnand %p1326_p1, %p1320_p6 }
  0x3f   : > { %1330 = shalt.err (!%p1327_p11)
}
  0x40   : > { %1145 = dma.hbm_to_vmem [thread:$0]  (!%p1579_p7), %s1818_s3, 1024, %s1583_s17, [#allocation8], %s1468_s20, %s1468_s20, %s1469_s21  }
  0x41   : > { %s1331_s23 = scalar_lea.hbm %s1820_s5, 1024 }
  0x42   : > { %p1332_p12 = scmp.ne.s32.totalorder %s1820_s5, %s1331_s23  ;;  %p1338_p2 = scmp.lt.u32.totalorder %s1331_s23, %s1820_s5 }
  0x44   : > { %p1334_p13 = pnand %p1332_p12, %p1595_p9 }
  0x46   : > { %p1335_p0 = pneg %p1334_p13 }
  0x48   : > { %p1340_p3 = pnand %p1338_p2, %p1335_p0 }
  0x4a   : > { %1343 = shalt.err (!%p1340_p3)
}
  0x4b   : > { %s1344_s14 = scalar_lea.vmem %s268_s19, 1024  ;;  %p1352_p1 = scmp.lt.s32.totalorder %s268_s19, %s268_s19 }
  0x4c   : > { %p1345_p6 = scmp.ne.s32.totalorder %s268_s19, %s1344_s14  ;;  %p1353_p11 = scmp.lt.s32.totalorder %s1344_s14, %s1344_s14 }
  0x4e   : > { %p1347_p8 = pnand %p1345_p6, %p1595_p9  ;;  %p1354_p4 = por %p1353_p11, %p1352_p1 }
  0x50   : > { %p1348_p10 = pneg %p1347_p8 }
  0x52   : > { %p1355_p5 = pnand %p1354_p4, %p1348_p10 }
  0x54   : > { %1358 = shalt.err (!%p1355_p5)
}
  0x55   : > { %1148 = dma.hbm_to_vmem [thread:$0]  (!%p1579_p7), %s1820_s5, 1024, %s268_s19, [#allocation11], %s1468_s20, %s1468_s20, %s1469_s21  }
  0x56   : > { %s31_s9 = sadd.s32 1, %s1455_s29  ;;  %s34_s15 = sadd.s32 1, %s1459_s30 }
  0x57   : > { %p32_p4 = scmp.ge.s32.totalorder %s31_s9, 4  ;;  %s38_s4 = ssub.s32 1, %s1459_s30 }
  0x58   : > { %s45_s6 = sadd.s32 1, %s1443_s26  ;;  %s39_s22 = smul.u32 %s1455_s29, %s38_s4 }
  0x59   : > { %s1850_s9 = smov (%p32_p4, %s31_s9), 0  ;;  %s1852_s15 = smov (!%p32_p4, %s34_s15), %s1459_s30 }
  0x5a   : > { %p52_p5 = scmp.ne.s32.totalorder %s1443_s26, %s1439_s25  ;;  %p36_p9 = scmp.ge.s32.totalorder %s1852_s15, 2 }
  0x5b   : > { %p53_p12 = scmp.eq.s32.totalorder %s1463_s8, 0  ;;  %p1156_p13 = scmp.lt.s32.totalorder %s1463_s8, 8 }
  0x5c   : > { %s284_s23 = sand.u32 1, %s1443_s26   ;;  %s1854_s15 = smov (%p36_p9, %s1852_s15), 0 }
  0x5d   : > { %p54_p7 = por %p53_p12, %p52_p5  ;;  %s40_s19 = ssub.s32 1, %s1854_s15 }
  0x5e   : > { %s988_s20 = sshll.u32 %s284_s23, 5  ;;  %s41_s21 = smul.u32 %s40_s19, %s1850_s9 }
  0x5f   : > { %s1044_s24 = sshll.u32 %s39_s22, 9  ;;  %s288_s13 = scalar_lea.vmem [#allocation5], %s988_s20 }
  0x60   : > { %s298_s16 = sshll.u32 %s288_s13, 4  ;;  %s42_s18 = ssub.s32 %s39_s22, %s41_s21  ;;  %s1689_s16 = int_to_ptr.vmem [resolvable:$true] %s298_s16 }
  0x61   : > { %s1687_s2 = scalar_lea.hbm %s1815_s0, %s1044_s24  ;;  %p43_p0 = scmp.eq.s32.totalorder %s42_s18, 0 }
  0x62   : > { %p1693_p2 = pnand %p1156_p13, %p54_p7  ;;  %s1700_s19 = scalar_lea.sflag [#allocation6], %s284_s23 }
  0x63   : > { %s1698_s22 = scalar_select %p43_p0, %s1443_s26, %s45_s6  }
  0x64   : > { %s1359_s20 = scalar_lea.hbm %s1687_s2, 512  ;;  %p1361_p6 = pneg %p1693_p2 }
  0x65   : > { %p1360_p3 = scmp.ne.s32.totalorder %s1687_s2, %s1359_s20  ;;  %s1364_s13 = scalar_lea.hbm %s1815_s0, 2048 }
  0x66   : > { %p1365_p1 = scmp.lt.u32.totalorder %s1687_s2, %s1815_s0  ;;  %p1366_p11 = scmp.lt.u32.totalorder %s1364_s13, %s1359_s20 }
  0x67   : > { %p1362_p8 = pnand %p1361_p6, %p1360_p3  ;;  %p1368_p5 = scmp.lt.u32.totalorder %s1359_s20, %s1687_s2 }
  0x68   : > { %p1367_p4 = por %p1366_p11, %p1365_p1 }
  0x69   : > { %p1363_p10 = pneg %p1362_p8 }
  0x6a   : > { %p1369_p9 = por %p1368_p5, %p1367_p4 }
  0x6c   : > { %p1370_p12 = pnand %p1369_p9, %p1363_p10 }
  0x6e   : > { %1373 = shalt.err (!%p1370_p12)
}
  0x6f   : > { %s1374_s6 = scalar_lea.vmem %s1689_s16, 512  ;;  %s1470_s23 = smov [#allocation5]  }
  0x70   : > { %p1375_p13 = scmp.ne.s32.totalorder %s1689_s16, %s1374_s6  ;;  %s1379_s17 = sshll.u32 %s1470_s23, 4  ;;  %s1380_s17 = int_to_ptr.vmem [resolvable:$false] %s1379_s17 }
  0x71   : > { %s1381_s21 = scalar_lea.vmem %s1380_s17, 1024  ;;  %p1382_p3 = scmp.lt.s32.totalorder %s1689_s16, %s1380_s17 }
  0x72   : > { %p1377_p7 = pnand %p1375_p13, %p1361_p6  ;;  %p1383_p8 = scmp.lt.s32.totalorder %s1381_s21, %s1374_s6 }
  0x74   : > { %p1378_p0 = pneg %p1377_p7  ;;  %p1384_p1 = por %p1383_p8, %p1382_p3 }
  0x76   : > { %p1385_p11 = pnand %p1384_p1, %p1378_p0 }
  0x78   : > { %1388 = shalt.err (!%p1385_p11)
}
  0x79   : > { %s1471_s20 = smov 256   ;;  %s1472_s24 = smov 16  }
  0x7a   : > { %1152 = dma.hbm_to_vmem [thread:$0]  (!%p1693_p2), %s1687_s2, 512, %s1689_s16, %s1700_s19, %s1471_s20, %s1471_s20, %s1472_s24  }
  0x7b   : > { %p1836_p6 = scmp.ne.s32.totalorder %s1832_s12, 0 }
  0x7c   : > { %s312_s13 = sand.u32 (!%p1836_p6), 1, %s1439_s25   ;;  %p1837_p10 = scmp.ne.s32.totalorder (!%p1836_p6), %s1831_s11, 0 }
  0x7d   : > { %310 = sbr.rel (%p1836_p6) target bundleno = 932 (0x3a4), region = 48  ;;  %s993_s18 = sshll.u32 (!%p1836_p6), %s312_s13, 5 }
  0x7e   : > { %s313_s14 = scalar_lea.sflag (!%p1836_p6), [#allocation6], %s312_s13  ;;  %s1731_s6 = scalar_lea.vmem (!%p1836_p6), [#allocation5], %s993_s18 }
  0x84   : > { %1422 = dma.done.wait (%p1837_p10), %s313_s14, 512  }
  0x85   : > { %1424 = vsyncadd (%p1837_p10), %s313_s14, 4294966784  ;;  %p1838_p4 = scmp.ne.s32.totalorder %s1830_s10, 0 }
  0x87   : > { %1426 = dma.done.wait (%p1838_p4), [#allocation8], 3072  }
  0x88   : > { %1428 = vsyncadd (%p1838_p4), [#allocation8], 4294964224 }
  0x89   : > { %1430 = dma.done.wait (%p1838_p4), [#allocation11], 1024  }
  0x8a   : > { %1432 = vsyncadd (%p1838_p4), [#allocation11], 4294966272  ;;  %s363_s12 = smul.u32 %s1447_s27, %s1451_s28  ;;  %p999_p5 = scmp.ne.s32.totalorder %s1451_s28, 0 }
  0x8b   : > { %p1000_p9 = scmp.ne.s32.totalorder (!%p999_p5), %s1447_s27, 0 }
  0x8c   : > { %s997_s16 = sshll.u32 %s363_s12, 1  ;;  %375 = sbr.rel (%p999_p5) target bundleno = 922 (0x39a), region = 68 }
  0x8d   : > { %p365_p2 = scmp.lt.s32.totalorder %s997_s16, 7 }
  0x8f   : > { %s1856_s16 = smov (!%p365_p2, %s997_s16), 7 }
  0x90   : > { %s998_s11 = sshll.u32 %s1856_s16, 3 }
  0x91   : > { %s1750_s19 = scalar_lea.vmem %s1822_s7, %s998_s11 }
  0x93   : > { %379 = sbr.rel (%p1000_p9) target bundleno = 154 (0x9a), region = 72  ;;  %v1473_v0 = vmov (!%p1000_p9), -inf   ;;  %v1474_v1 = vmov (!%p1000_p9), 0.0  }
  0x94   : > { %380 = vst [vmem:[#allocation3] sm:$0x1] (!%p1000_p9), %v1473_v0  ;;  %381 = vst [vmem:[#allocation4] sm:$0x1] (!%p1000_p9), %v1474_v1 }
  0x9a PF: > { %v1235_v2 = vld [vmem:[#allocation7 + $0x40] sm:$0xff]   ;;  %v1475_v4 = vmov 0.0   ;;  %v1237_v5 = vld [vmem:[#allocation7 + $0x48] sm:$0xff]   ;;  %v1239_v7 = vld [vmem:[#allocation7 + $0x50] sm:$0xff]   ;;  %vm1476_vm0 = vmmov 0   ;;  %s1839_s17 = sld [smem:[#allocation15_spill]] }
  0x9b   : > { %v1236_v3 = vld [vmem:[#allocation7] sm:$0xff]   ;;  %1085 = vmatprep.subr.bf16.mxu1 %v1475_v4  ;;  %1045 = vmatprep.subr.bf16.mxu0 %v1235_v2  ;;  %v1238_v6 = vld [vmem:[#allocation7 + $0x8] sm:$0xff]   ;;  %v1240_v8 = vld [vmem:[#allocation7 + $0x10] sm:$0xff]   ;;  %s1840_s24 = sld [smem:[#allocation16_spill]]  ;;  %s1841_s14 = sld [smem:[#allocation17_spill]] }
  0x9c   : > { %1046 = vmatpush3.bf16.msra.mxu0 %v1236_v3  ;;  %v1241_v9 = vld [vmem:[#allocation7 + $0x58] sm:$0xff]   ;;  %v1243_v11 = vld [vmem:[#allocation7 + $0x60] sm:$0xff]   ;;  %v1245_v13 = vld [vmem:[#allocation7 + $0x68] sm:$0xff]   ;;  %1101 = vmatprep.mubr.msk.bf16.mxu1 %vm1476_vm0, %v1475_v4  ;;  %p1037_p12 = scmp.ne.s32.totalorder %s1447_s27, 3 }
  0x9d   : > { %1047 = vmatprep.subr.bf16.mxu0 %v1237_v5  ;;  %v1242_v10 = vld [vmem:[#allocation7 + $0x18] sm:$0xff]   ;;  %v1244_v12 = vld [vmem:[#allocation7 + $0x20] sm:$0xff]   ;;  %v383_v14 = vld [vmem:[%s1731_s6 + $0x8] sm:$0xff] }
  0x9e   : > { %v385_v15 = vld [vmem:[%s1731_s6 + $0x18] sm:$0xff]  ;;  %v1246_v16 = vld [vmem:[#allocation7 + $0x28] sm:$0xff]   ;;  %v1251_v18 = vld [vmem:[#allocation9] sm:$0xff]  }
  0x9f   : > { %v387_v17 = vpack.c.bf16 %v385_v15, %v383_v14  ;;  %v1247_v19 = vld [vmem:[#allocation7 + $0x70] sm:$0xff]   ;;  %1086 = vmatpush3.bf16.msra.mxu1 %v1251_v18  ;;  %v1252_v20 = vld [vmem:[#allocation9 + $0x8] sm:$0xff]   ;;  %v1249_v22 = vld [vmem:[#allocation7 + $0x78] sm:$0xff]  }
  0xa0   : > { %1048 = vmatpush3.bf16.msra.mxu0 %v1238_v6  ;;  %v1248_v21 = vld [vmem:[#allocation7 + $0x30] sm:$0xff]   ;;  %1087 = vmatprep.subr.bf16.mxu1 %v1475_v4  ;;  %v1250_v24 = vld [vmem:[#allocation7 + $0x38] sm:$0xff]   ;;  %v382_v25 = vld [vmem:[%s1731_s6] sm:$0xff] }
  0xa1   : > { %1049 = vmatprep.subr.bf16.mxu0 %v1239_v7  ;;  %555 = vmatprep.mubr.bf16.mxu0 %v387_v17  ;;  %v1253_v23 = vld [vmem:[#allocation9 + $0x10] sm:$0xff]   ;;  %v1254_v27 = vld [vmem:[#allocation9 + $0x18] sm:$0xff]   ;;  %v1255_v29 = vld [vmem:[#allocation9 + $0x20] sm:$0xff]  }
  0xa2   : > { %v384_v26 = vld [vmem:[%s1731_s6 + $0x10] sm:$0xff]  ;;  %v1256_v30 = vld [vmem:[#allocation9 + $0x28] sm:$0xff]   ;;  %v1258_v32 = vld [vmem:[#allocation9 + $0x38] sm:$0xff]   ;;  %s1036_s6 = sshll.u32 %s1447_s27, 4 }
  0xa3   : > { %1088 = vmatpush3.bf16.msra.mxu1 %v1252_v20  ;;  %v386_v28 = vpack.c.bf16 %v384_v26, %v382_v25  ;;  %v1257_v31 = vld [vmem:[#allocation9 + $0x30] sm:$0xff]   ;;  %v1259_v33 = vld [vmem:[#allocation10] sm:$0xff]   ;;  %v1260_v34 = vld [vmem:[#allocation10 + $0x8] sm:$0xff]   ;;  %s797_s12 = scalar_lea.vmem [#allocation2], %s1036_s6 }
  0xa4   : > { %1050 = vmatpush3.bf16.msra.mxu0 %v1240_v8  ;;  %1089 = vmatprep.subr.bf16.mxu1 %v1475_v4  ;;  %v1261_v35 = vld [vmem:[#allocation10 + $0x10] sm:$0xff]   ;;  %v1262_v36 = vld [vmem:[#allocation10 + $0x18] sm:$0xff]   ;;  %v1263_v37 = vld [vmem:[#allocation10 + $0x20] sm:$0xff]  }
  0xa5   : > { %1051 = vmatprep.subr.bf16.mxu0 %v1241_v9  ;;  %v1264_v38 = vld [vmem:[#allocation10 + $0x28] sm:$0xff]   ;;  %v1001_v40 = vld [vmem:[%s1839_s17] ss:$0 sm:$0xff]  ;;  %v1265_v51 = vld [vmem:[#allocation10 + $0x30] sm:$0xff]  }
  0xa6   : > { %v1266_v52 = vld [vmem:[#allocation10 + $0x38] sm:$0xff]  }
  0xa7   : > { %1090 = vmatpush3.bf16.msra.mxu1 %v1253_v23  ;;  %v1018_v53 = vld [vmem:[%s1840_s24] ss:$0 sm:$0xff] }
  0xa8   : > { %1052 = vmatpush3.bf16.msra.mxu0 %v1242_v10  ;;  %1091 = vmatprep.subr.bf16.mxu1 %v1475_v4  ;;  %v1027_v63 = vld [vmem:[%s1841_s14] ss:$0 sm:$0xff] }
  0xa9   : > { %1053 = vmatprep.subr.bf16.mxu0 %v1243_v11  ;;  %v815_v11 = vlaneseq }
  0xab   : > { %1092 = vmatpush3.bf16.msra.mxu1 %v1254_v27  ;;  %v816_v14 = vshrl.u32 %v815_v11, 7 }
  0xac   : > { %1054 = vmatpush3.bf16.msra.mxu0 %v1244_v12  ;;  %1093 = vmatprep.subr.bf16.mxu1 %v1475_v4 }
  0xad   : > { %1055 = vmatprep.subr.bf16.mxu0 %v1245_v13  ;;  %v817_v18 = vsub.s32 0, %v816_v14 }
  0xaf   : > { %1094 = vmatpush3.bf16.msra.mxu1 %v1255_v29 }
  0xb0   : > { %1056 = vmatpush3.bf16.msra.mxu0 %v1246_v16  ;;  %1095 = vmatprep.subr.bf16.mxu1 %v1475_v4  ;;  %v800_v16 = vld [vmem:[#allocation3] sm:$0x1] }
  0xb1   : > { %1057 = vmatprep.subr.bf16.mxu0 %v1247_v19 }
  0xb3   : > { %1096 = vmatpush3.bf16.msra.mxu1 %v1256_v30 }
  0xb4   : > { %1058 = vmatpush3.bf16.msra.mxu0 %v1248_v21  ;;  %1097 = vmatprep.subr.bf16.mxu1 %v1475_v4 }
  0xb5   : > { %1059 = vmatprep.subr.bf16.mxu0 %v1249_v22 }
  0xb7   : > { %1098 = vmatpush3.bf16.msra.mxu1 %v1257_v31 }
  0xb8   : > { %1060 = vmatpush3.bf16.msra.mxu0 %v1250_v24  ;;  %1099 = vmatprep.subr.bf16.mxu1 %v1475_v4 }
  0xb9   : > { %1105 = vmatprep.subr.bf16.mxu0 %v1475_v4 }
  0xbb   : > { %556 = vmatmul.mubr.bf16.vlgmr.msra.gmra.mrb[0].mxu0 %v386_v28  ;;  %1100 = vmatpush3.bf16.msra.mxu1 %v1258_v32 }
  0xbc   : > { %1121 = vmatprep.mubr.msk.bf16.mxu0 %vm1476_vm0, %v1475_v4  ;;  %1106 = vmatpush3.bf16.msra.mxu0 %v1259_v33 }
  0xbd   : > { %1107 = vmatprep.subr.bf16.mxu0 %v1475_v4 }
  0xc0   : > { %1108 = vmatpush3.bf16.msra.mxu0 %v1260_v34 }
  0xc1   : > { %1109 = vmatprep.subr.bf16.mxu0 %v1475_v4 }
  0xc4   : > { %1110 = vmatpush3.bf16.msra.mxu0 %v1261_v35  ;;  %v809_v35 = vld [vmem:[#allocation4] sm:$0x1] }
  0xc5   : > { %1111 = vmatprep.subr.bf16.mxu0 %v1475_v4 }
  0xc8   : > { %1112 = vmatpush3.bf16.msra.mxu0 %v1262_v36 }
  0xc9   : > { %1113 = vmatprep.subr.bf16.mxu0 %v1475_v4 }
  0xcc   : > { %1114 = vmatpush3.bf16.msra.mxu0 %v1263_v37 }
  0xcd   : > { %1115 = vmatprep.subr.bf16.mxu0 %v1475_v4 }
  0xd0   : > { %1116 = vmatpush3.bf16.msra.mxu0 %v1264_v38 }
  0xd1   : > { %1117 = vmatprep.subr.bf16.mxu0 %v1475_v4 }
  0xd4   : > { %1118 = vmatpush3.bf16.msra.mxu0 %v1265_v51 }
  0xd5   : > { %1119 = vmatprep.subr.bf16.mxu0 %v1475_v4 }
  0xd8   : > { %1120 = vmatpush3.bf16.msra.mxu0 %v1266_v52 }
 0x18e   : > { %v1061_v39 = vpop.f32.mrb[0].mxu0 }
 0x18f   : > { %v1062_v41 = vpop.f32.mrb[1].mxu0 }
 0x190   : > { %v1063_v42 = vadd.f32 %v1062_v41, %v1061_v39  ;;  %v1064_v43 = vpop.f32.mrb[2].mxu0 }
 0x191   : > { %v1065_v44 = vpop.f32.mrb[3].mxu0 }
 0x192   : > { %v558_v45 = vadd.f32 %v1063_v42, %v1001_v40  ;;  %v1066_v46 = vadd.f32 %v1065_v44, %v1064_v43 }
 0x194   : > { %v561_v47 = vadd.f32 %v1066_v46, %v1001_v40  ;;  %v564_v48 = vmax.f32 %v558_v45, 0.0 }
 0x196   : > { %v565_v49 = vmax.f32 %v561_v47, 0.0 }
 0x198   : > { %v566_v50 = vpack.c.bf16 %v565_v49, %v564_v48 }
 0x19a   : > { %1102 = vmatmul.mubr.bf16.vlgmr.msra.gmra.mrb[0].mxu1 %v566_v50 }
 0x26d   : > { %v672_v54 = vpop.f32.mrb[0].mxu1 }
 0x26e   : > { %v673_v55 = vadd.f32 %v1018_v53, %v672_v54  ;;  %v1103_v56 = vpop.f32.mrb[1].mxu1 }
 0x26f   : > { %v675_v57 = vpop.f32.mrb[2].mxu1 }
 0x270   : > { %v676_v58 = vadd.f32 %v1018_v53, %v675_v57  ;;  %v1104_v59 = vpop.f32.mrb[3].mxu1  ;;  %v679_v60 = vmax.f32 %v673_v55, 0.0 }
 0x272   : > { %v680_v61 = vmax.f32 %v676_v58, 0.0 }
 0x274   : > { %v681_v62 = vpack.c.bf16 %v680_v61, %v679_v60 }
 0x276   : > { %1122 = vmatmul.mubr.bf16.vlgmr.msra.gmra.mrb[4].mxu0 %v681_v62 }
 0x349   : > { %v787_v0 = vpop.f32.mrb[4].mxu0 }
 0x34a   : > { %v788_v1 = vadd.f32 %v1027_v63, %v787_v0  ;;  %v1123_v2 = vpop.f32.mrb[5].mxu0 }
 0x34b   : > { %v790_v3 = vpop.f32.mrb[6].mxu0 }
 0x34c   : > { %v794_v4 = vmax.f32 %v788_v1, 0.0  ;;  %v791_v5 = vadd.f32 %v1027_v63, %v790_v3  ;;  %v1124_v6 = vpop.f32.mrb[7].mxu0 }
 0x34e   : > { %798 = vst [vmem:[%s797_s12] sm:$0xff] %v794_v4  ;;  %v795_v7 = vmax.f32 %v791_v5, 0.0 }
 0x350   : > { %799 = vst [vmem:[%s797_s12 + $0x8] sm:$0xff] %v795_v7  ;;  %v801_v8 = vmax.f32 %v794_v4, %v795_v7 }
 0x352   : > { %v802_v9 = vrot.slane %v801_v8, 4 }
 0x354   : > { %v803_v10 = vmax.f32 %v801_v8, %v802_v9 }
 0x356   : > { %v804_v12 = vrot.slane %v803_v10, 2 }
 0x358   : > { %v805_v13 = vmax.f32 %v803_v10, %v804_v12 }
 0x35a   : > { %v806_v15 = vrot.slane %v805_v13, 1 }
 0x35c   : > { %v807_v17 = vmax.f32 %v805_v13, %v806_v15 }
 0x35e   : > { %v808_v19 = vmax.f32 %v800_v16, %v807_v17 }
 0x360   : > { %v818_v20 = vrot.slane %v808_v19, %v817_v18  ;;  %835 = vst [vmem:[#allocation3] sm:$0x1] %v808_v19  ;;  %v810_v25 = vsub.f32 %v800_v16, %v808_v19 }
 0x362   : > { %v820_v21 = vsub.f32 %v794_v4, %v818_v20  ;;  %v821_v22 = vsub.f32 %v795_v7, %v818_v20  ;;  %v811_v26 = vmul.f32 1.442695, %v810_v25 }
 0x364   : > { %v822_v23 = vmul.f32 1.442695, %v820_v21  ;;  %v824_v24 = vmul.f32 1.442695, %v821_v22 }
 0x366   : > { %1267 = vpow2.f32 %v822_v23 }
 0x367   : > { %1269 = vpow2.f32 %v824_v24  ;;  %v840_v42 = vld [vmem:[#allocation3] sm:$0x1] (!%p1037_p12) }
 0x368   : > { %1271 = vpow2.f32 %v811_v26 }
 0x370   : > { %v1268_v27 = vpop.eup %1267 }
 0x371   : > { %v1270_v28 = vpop.eup %1269 }
 0x372   : > { %v826_v29 = vadd.f32 %v1270_v28, %v1268_v27  ;;  %v1272_v34 = vpop.eup %1271 }
 0x373   : > { %v813_v37 = vmul.f32 %v1272_v34, %v809_v35 }
 0x374   : > { %v827_v30 = vrot.slane %v826_v29, 4 }
 0x376   : > { %v828_v31 = vadd.f32 %v827_v30, %v826_v29 }
 0x378   : > { %v829_v32 = vrot.slane %v828_v31, 2 }
 0x37a   : > { %v830_v33 = vadd.f32 %v829_v32, %v828_v31 }
 0x37c   : > { %v831_v36 = vrot.slane %v830_v33, 1  ;;  %839 = sbr.rel (%p1037_p12) target bundleno = 922 (0x39a), region = 76 }
 0x37e   : > { %v832_v38 = vadd.f32 %v831_v36, %v830_v33 }
 0x380   : > { %v833_v39 = vadd.f32 %v832_v38, %v813_v37 }
 0x382   : > { %834 = vst [vmem:[#allocation4] sm:$0x1] %v833_v39 }
 0x389   : > { %v841_v40 = vld [vmem:[#allocation4] sm:$0x1] }
 0x38a   : > { %1273 = vlog2.f32 %v841_v40 }
 0x394   : > { %v1274_v41 = vpop.eup %1273 }
 0x395   : > { %v843_v43 = vmul.f32 0.6931472, %v1274_v41 }
 0x397   : > { %v844_v44 = vadd.f32 %v843_v43, %v840_v42 }
 0x399   : > { %845 = vst [vmem:[#allocation3] sm:$0x1] %v844_v44 }
 0x39a PF: > { %p1038_p13 = scmp.ne.s32.totalorder %s1451_s28, 1 }
 0x39b   : > { %s1039_s16 = sshll.u32 (!%p1038_p13), %s1447_s27, 4  ;;  %vm863_vm1 = vcmask (!%p1038_p13), 80896  }
 0x39c   : > { %849 = sbr.rel (%p1038_p13) target bundleno = 932 (0x3a4), region = 80  ;;  %s851_s11 = scalar_lea.vmem (!%p1038_p13), [#allocation2], %s1039_s16 }
 0x39d   : > { %v852_v46 = vld [vmem:[%s851_s11] sm:$0xff] (!%p1038_p13)  ;;  %v853_v47 = vld [vmem:[%s851_s11 + $0x8] sm:$0xff] (!%p1038_p13) }
 0x3a0   : > { %v1040_v45 = vld [vmem:[#allocation3] ss:$0 sm:$0xff] (!%p1038_p13) }
 0x3a1   : > { %v861_v48 = vsub.f32 (!%p1038_p13), %v852_v46, %v1040_v45  ;;  %v862_v49 = vsub.f32 (!%p1038_p13), %v853_v47, %v1040_v45 }
 0x3a3   : > { %864 = vst.msk [vmem:[%s1750_s19] sm:$0xff] %vm863_vm1, %v861_v48  ;;  %865 = vst.msk [vmem:[%s1750_s19 + $0x8] sm:$0xff] %vm863_vm1, %v862_v49 }
 0x3a4 PF: > { %s22_s8 = sadd.s32 1, %s1463_s8   ;;  %s1842_s24 = smov %s1439_s25 }
 0x3a5   : > { %p19_p7 = scmp.ge.s32.totalorder %s22_s8, 10   ;;  %s1843_s25 = smov %s1443_s26 }
 0x3a6   : > { %s1844_s26 = smov %s1698_s22  ;;  %s1845_s27 = smov %s1455_s29 }
 0x3a7   : > { %s1846_s28 = smov %s1459_s30  ;;  %s1847_s29 = smov %s1850_s9 }
 0x3a8   : > { %s1848_s30 = smov %s1854_s15  ;;  %21 = sbr.rel (!%p19_p7) target bundleno = 11 (0xb), region = 118 }
 0x3af   :  { %891 = vsyncpa [#allocation6], 1 }
 0x3b0   :  { %893 = vsyncpa [#allocation6 + $0x1], 1 }
 0x3b1   :  { %894 = vsyncpa [#allocation8], 1 }
 0x3b2   :  { %895 = vsyncpa [#allocation11], 1 }

</bundles_post_ra>
